<compile_context>
chip_gen: v7x
topology: tpu7x:2x2x1
jax: 0.10.0
libtpu: 0.0.40
codegen_flags: <defaults>
</compile_context>

<pallas_src>
import jax
import jax.numpy as jnp
from jax.experimental import pallas as pl
from jax.experimental.pallas import tpu as pltpu


def _round_up(x, m):
    return ((x + m - 1) // m) * m


def _affine(w, b, v):
    """y = w @ v + b  with  w:(Cout,Cin), v:(Cin,TM), b:(Cout,1) -> (Cout,TM).

    For small contraction dims (the usual case in UNet attention gates) this
    is an unrolled VPU broadcast-MAC; for large Cin it uses the MXU.
    """
    cout, cin = w.shape
    tm = v.shape[-1]
    if cin >= 64:
        return jnp.dot(w, v, preferred_element_type=jnp.float32) + b
    acc = jnp.broadcast_to(b, (cout, tm)).astype(jnp.float32)
    for c in range(cin):  # static unroll; cin is a small compile-time constant
        acc = acc + w[:, c:c + 1] * v[c:c + 1, :]
    return acc


def _attention_kernel(g_ref, x_ref,
                      wg_ref, bg_ref,
                      wx_ref, bx_ref,
                      wp_ref, bp_ref,
                      out_ref):
    # g_ref: (F_g, TM), x_ref: (F_l, TM)   (channels on sublanes, pixels on lanes)
    # wg_ref: (F_int, F_g), bg_ref: (F_int, 1)   (bias + folded BN)
    # wx_ref: (F_int, F_l), bx_ref: (F_int, 1)
    # wp_ref: (1, F_int),   bp_ref: (1, 1)
    g = g_ref[...].astype(jnp.float32)
    x = x_ref[...].astype(jnp.float32)

    g1 = _affine(wg_ref[...], bg_ref[...], g)      # (F_int, TM)
    x1 = _affine(wx_ref[...], bx_ref[...], x)      # (F_int, TM)
    act = jnp.maximum(g1 + x1, 0.0)                # ReLU (VPU)

    psi = _affine(wp_ref[...], bp_ref[...], act)   # (1, TM)
    psi = jax.nn.sigmoid(psi)                      # EUP

    out_ref[...] = (x * psi).astype(out_ref.dtype)  # gate; lane-dense store


def attention_block_pallas(g_nchw, x_nchw, params, *, tile_m=512):
    """Apply the attention block.

    g_nchw: (N, F_g, H, W) float32
    x_nchw: (N, F_l, H, W) float32
    params: dict with folded conv+BN weights (see make_params), weights in
            (C_out, C_in) orientation, biases as (C_out, 1).
    Returns (N, F_l, H, W) float32 (same semantics as the PyTorch module with
    BatchNorm in eval mode).
    """
    N, F_g, H, W = g_nchw.shape
    _, F_l, _, _ = x_nchw.shape
    F_int = params["wg"].shape[0]
    assert tile_m % 128 == 0, "tile_m must be a multiple of 128 (lane width)"

    M = H * W
    tile = min(tile_m, _round_up(M, 128))
    M_pad = _round_up(M, tile)

    # Free reshapes, no transpose / extra HBM round-trip.
    g3 = g_nchw.reshape(N, F_g, M)
    x3 = x_nchw.reshape(N, F_l, M)
    if M_pad != M:
        pad = M_pad - M
        g3 = jnp.pad(g3, ((0, 0), (0, 0), (0, pad)))
        x3 = jnp.pad(x3, ((0, 0), (0, 0), (0, pad)))

    grid = (N, M_pad // tile)

    out3 = pl.pallas_call(
        _attention_kernel,
        out_shape=jax.ShapeDtypeStruct((N, F_l, M_pad), x_nchw.dtype),
        grid_spec=pltpu.PrefetchScalarGridSpec(
            num_scalar_prefetch=0,
            grid=grid,
            in_specs=[
                pl.BlockSpec((None, F_g, tile), lambda n, j: (n, 0, j)),  # g tile
                pl.BlockSpec((None, F_l, tile), lambda n, j: (n, 0, j)),  # x tile
                pl.BlockSpec((F_int, F_g), lambda n, j: (0, 0)),          # W_g
                pl.BlockSpec((F_int, 1),   lambda n, j: (0, 0)),          # b_g (folded)
                pl.BlockSpec((F_int, F_l), lambda n, j: (0, 0)),          # W_x
                pl.BlockSpec((F_int, 1),   lambda n, j: (0, 0)),          # b_x (folded)
                pl.BlockSpec((1, F_int),   lambda n, j: (0, 0)),          # W_psi
                pl.BlockSpec((1, 1),       lambda n, j: (0, 0)),          # b_psi (folded)
            ],
            out_specs=pl.BlockSpec((None, F_l, tile), lambda n, j: (n, 0, j)),
        ),
        compiler_params=pltpu.CompilerParams(
            dimension_semantics=("parallel", "parallel")),
    )(g3, x3,
      params["wg"], params["bg"],
      params["wx"], params["bx"],
      params["wp"], params["bp"])

    if M_pad != M:
        out3 = out3[:, :, :M]
    return out3.reshape(N, F_l, H, W)


def _fold_bn(w, b, gamma, beta, mean, var, eps=1e-5):
    """Fold conv bias + eval-mode BatchNorm into (W_folded, shift).

    conv: y = W @ x + b ; BN(eval): (y - mean)/sqrt(var+eps)*gamma + beta
    => y = (W*scale) @ x + (b - mean)*scale + beta       (W is (C_out, C_in))
    """
    scale = gamma / jnp.sqrt(var + eps)                  # (C_out,)
    w_f = w * scale[:, None]
    b_f = (b - mean) * scale + beta
    return w_f.astype(jnp.float32), b_f.reshape(-1, 1).astype(jnp.float32)


def make_params(key, F_g, F_l, F_int):
    """Deterministic synthetic parameters matching the PyTorch module shapes.

    PyTorch conv weights are (C_out, C_in, 1, 1); we keep that (C_out, C_in)
    orientation for the channels-on-sublanes matmul. BN uses eval-mode
    running stats (synthetic, non-trivial values).
    """
    ks = jax.random.split(key, 12)

    def conv_w(k, cout, cin):
        return jax.random.normal(k, (cout, cin), jnp.float32) * 0.1

    # W_g branch
    wg = conv_w(ks[0], F_int, F_g)
    bg = jax.random.normal(ks[1], (F_int,), jnp.float32) * 0.05
    gg = 1.0 + 0.1 * jax.random.normal(ks[2], (F_int,), jnp.float32)
    bgn = 0.05 * jax.random.normal(ks[3], (F_int,), jnp.float32)
    mg = 0.1 * jax.random.normal(ks[4], (F_int,), jnp.float32)
    vg = jnp.abs(1.0 + 0.1 * jax.random.normal(ks[5], (F_int,), jnp.float32))

    # W_x branch
    wx = conv_w(ks[6], F_int, F_l)
    bx = jax.random.normal(ks[7], (F_int,), jnp.float32) * 0.05
    gx = 1.0 + 0.1 * jax.random.normal(ks[8], (F_int,), jnp.float32)
    bxn = 0.05 * jax.random.normal(ks[9], (F_int,), jnp.float32)
    mx = 0.1 * jax.random.normal(ks[10], (F_int,), jnp.float32)
    vx = jnp.abs(1.0 + 0.1 * jax.random.normal(ks[11], (F_int,), jnp.float32))

    # psi branch (F_int -> 1)
    kp = jax.random.split(jax.random.fold_in(key, 99), 6)
    wp = conv_w(kp[0], 1, F_int)
    bp = jax.random.normal(kp[1], (1,), jnp.float32) * 0.05
    gp = 1.0 + 0.1 * jax.random.normal(kp[2], (1,), jnp.float32)
    bpn = 0.05 * jax.random.normal(kp[3], (1,), jnp.float32)
    mp = 0.1 * jax.random.normal(kp[4], (1,), jnp.float32)
    vp = jnp.abs(1.0 + 0.1 * jax.random.normal(kp[5], (1,), jnp.float32))

    wg_f, bg_f = _fold_bn(wg, bg, gg, bgn, mg, vg)
    wx_f, bx_f = _fold_bn(wx, bx, gx, bxn, mx, vx)
    wp_f, bp_f = _fold_bn(wp, bp, gp, bpn, mp, vp)

    return {"wg": wg_f, "bg": bg_f,
            "wx": wx_f, "bx": bx_f,
            "wp": wp_f, "bp": bp_f}


def attention_block_ref(g_nchw, x_nchw, params):
    """Pure-jnp reference of the same (BN-folded) forward pass."""
    N, F_g, H, W = g_nchw.shape
    F_l = x_nchw.shape[1]
    gm = g_nchw.reshape(N, F_g, H * W)
    xm = x_nchw.reshape(N, F_l, H * W)
    g1 = jnp.einsum('oc,ncm->nom', params["wg"], gm) + params["bg"][None]
    x1 = jnp.einsum('oc,ncm->nom', params["wx"], xm) + params["bx"][None]
    act = jnp.maximum(g1 + x1, 0.0)
    psi = jax.nn.sigmoid(
        jnp.einsum('oc,ncm->nom', params["wp"], act) + params["bp"][None])
    return (xm * psi).reshape(N, F_l, H, W)


if __name__ == "__main__":
    N, F_g, F_l, F_int, H, W = 2, 4, 4, 8, 16, 16

    key = jax.random.PRNGKey(0)
    kg, kx, kp = jax.random.split(key, 3)
    g = jax.random.normal(kg, (N, F_g, H, W), jnp.float32)
    x = jax.random.normal(kx, (N, F_l, H, W), jnp.float32)
    params = make_params(kp, F_g, F_l, F_int)

    out = attention_block_pallas(g, x, params, tile_m=512)
    out = jax.block_until_ready(out)

    ref = attention_block_ref(g, x, params)
    assert out.shape == (N, F_l, H, W)
    assert jnp.allclose(out, ref, atol=1e-5, rtol=1e-5), "mismatch vs reference"

    print("KERNEL_OK")
</pallas_src>

<mosaic_0001>
module attributes {stable_mosaic.version = 11 : i64} {
  func.func @_attention_kernel(%arg0: i32, %arg1: i32, %arg2: memref<1x4x256xf32, #tpu.memory_space<vmem>>, %arg3: memref<1x4x256xf32, #tpu.memory_space<vmem>>, %arg4: memref<8x4xf32, #tpu.memory_space<vmem>>, %arg5: memref<8x1xf32, #tpu.memory_space<vmem>>, %arg6: memref<8x4xf32, #tpu.memory_space<vmem>>, %arg7: memref<8x1xf32, #tpu.memory_space<vmem>>, %arg8: memref<1x8xf32, #tpu.memory_space<vmem>>, %arg9: memref<1x1xf32, #tpu.memory_space<vmem>>, %arg10: memref<1x4x256xf32, #tpu.memory_space<vmem>>) attributes {dimension_semantics = [#tpu.dimension_semantics<parallel>, #tpu.dimension_semantics<parallel>], iteration_bounds = array<i64: 2, 1>, scalar_prefetch = 0 : i64, scratch_operands = 0 : i64, tpu.core_type = #tpu.core_type<tc>, window_params = [{transform_indices = @transform_0, window_bounds = array<i64: 1, 4, 256>}, {transform_indices = @transform_1, window_bounds = array<i64: 1, 4, 256>}, {pipeline_mode = #tpu.pipeline_mode<synchronous>, transform_indices = @transform_2, window_bounds = array<i64: 8, 4>}, {pipeline_mode = #tpu.pipeline_mode<synchronous>, transform_indices = @transform_3, window_bounds = array<i64: 8, 1>}, {pipeline_mode = #tpu.pipeline_mode<synchronous>, transform_indices = @transform_4, window_bounds = array<i64: 8, 4>}, {pipeline_mode = #tpu.pipeline_mode<synchronous>, transform_indices = @transform_5, window_bounds = array<i64: 8, 1>}, {pipeline_mode = #tpu.pipeline_mode<synchronous>, transform_indices = @transform_6, window_bounds = array<i64: 1, 8>}, {pipeline_mode = #tpu.pipeline_mode<synchronous>, transform_indices = @transform_7, window_bounds = array<i64: 1, 1>}, {transform_indices = @transform_8, window_bounds = array<i64: 1, 4, 256>}]} {
    %c0 = arith.constant 0 : index
    %c0_0 = arith.constant 0 : index
    %c0_1 = arith.constant 0 : index
    %0 = vector.load %arg2[%c0, %c0_0, %c0_1] : memref<1x4x256xf32, #tpu.memory_space<vmem>>, vector<1x4x256xf32>
    %1 = vector.shape_cast %0 : vector<1x4x256xf32> to vector<4x256xf32>
    %c0_2 = arith.constant 0 : index
    %c0_3 = arith.constant 0 : index
    %c0_4 = arith.constant 0 : index
    %2 = vector.load %arg3[%c0_2, %c0_3, %c0_4] : memref<1x4x256xf32, #tpu.memory_space<vmem>>, vector<1x4x256xf32>
    %3 = vector.shape_cast %2 : vector<1x4x256xf32> to vector<4x256xf32>
    %c0_5 = arith.constant 0 : index
    %c0_6 = arith.constant 0 : index
    %4 = vector.load %arg4[%c0_5, %c0_6] : memref<8x4xf32, #tpu.memory_space<vmem>>, vector<8x4xf32>
    %c0_7 = arith.constant 0 : index
    %c0_8 = arith.constant 0 : index
    %5 = vector.load %arg5[%c0_7, %c0_8] : memref<8x1xf32, #tpu.memory_space<vmem>>, vector<8x1xf32>
    %6 = vector.shape_cast %5 : vector<8x1xf32> to vector<8x1xf32>
    %7 = vector.broadcast %6 : vector<8x1xf32> to vector<8x256xf32>
    %8 = vector.extract_strided_slice %4 {offsets = [0, 0], sizes = [8, 1], strides = [1, 1]} : vector<8x4xf32> to vector<8x1xf32>
    %9 = vector.extract_strided_slice %1 {offsets = [0, 0], sizes = [1, 256], strides = [1, 1]} : vector<4x256xf32> to vector<1x256xf32>
    %10 = vector.broadcast %8 : vector<8x1xf32> to vector<8x256xf32>
    %11 = vector.broadcast %9 : vector<1x256xf32> to vector<8x256xf32>
    %12 = arith.mulf %10, %11 : vector<8x256xf32>
    %13 = arith.addf %7, %12 : vector<8x256xf32>
    %14 = vector.extract_strided_slice %4 {offsets = [0, 1], sizes = [8, 1], strides = [1, 1]} : vector<8x4xf32> to vector<8x1xf32>
    %15 = vector.extract_strided_slice %1 {offsets = [1, 0], sizes = [1, 256], strides = [1, 1]} : vector<4x256xf32> to vector<1x256xf32>
    %16 = vector.broadcast %14 : vector<8x1xf32> to vector<8x256xf32>
    %17 = vector.broadcast %15 : vector<1x256xf32> to vector<8x256xf32>
    %18 = arith.mulf %16, %17 : vector<8x256xf32>
    %19 = arith.addf %13, %18 : vector<8x256xf32>
    %20 = vector.extract_strided_slice %4 {offsets = [0, 2], sizes = [8, 1], strides = [1, 1]} : vector<8x4xf32> to vector<8x1xf32>
    %21 = vector.extract_strided_slice %1 {offsets = [2, 0], sizes = [1, 256], strides = [1, 1]} : vector<4x256xf32> to vector<1x256xf32>
    %22 = vector.broadcast %20 : vector<8x1xf32> to vector<8x256xf32>
    %23 = vector.broadcast %21 : vector<1x256xf32> to vector<8x256xf32>
    %24 = arith.mulf %22, %23 : vector<8x256xf32>
    %25 = arith.addf %19, %24 : vector<8x256xf32>
    %26 = vector.extract_strided_slice %4 {offsets = [0, 3], sizes = [8, 1], strides = [1, 1]} : vector<8x4xf32> to vector<8x1xf32>
    %27 = vector.extract_strided_slice %1 {offsets = [3, 0], sizes = [1, 256], strides = [1, 1]} : vector<4x256xf32> to vector<1x256xf32>
    %28 = vector.broadcast %26 : vector<8x1xf32> to vector<8x256xf32>
    %29 = vector.broadcast %27 : vector<1x256xf32> to vector<8x256xf32>
    %30 = arith.mulf %28, %29 : vector<8x256xf32>
    %31 = arith.addf %25, %30 : vector<8x256xf32>
    %c0_9 = arith.constant 0 : index
    %c0_10 = arith.constant 0 : index
    %32 = vector.load %arg6[%c0_9, %c0_10] : memref<8x4xf32, #tpu.memory_space<vmem>>, vector<8x4xf32>
    %c0_11 = arith.constant 0 : index
    %c0_12 = arith.constant 0 : index
    %33 = vector.load %arg7[%c0_11, %c0_12] : memref<8x1xf32, #tpu.memory_space<vmem>>, vector<8x1xf32>
    %34 = vector.shape_cast %33 : vector<8x1xf32> to vector<8x1xf32>
    %35 = vector.broadcast %34 : vector<8x1xf32> to vector<8x256xf32>
    %36 = vector.extract_strided_slice %32 {offsets = [0, 0], sizes = [8, 1], strides = [1, 1]} : vector<8x4xf32> to vector<8x1xf32>
    %37 = vector.extract_strided_slice %3 {offsets = [0, 0], sizes = [1, 256], strides = [1, 1]} : vector<4x256xf32> to vector<1x256xf32>
    %38 = vector.broadcast %36 : vector<8x1xf32> to vector<8x256xf32>
    %39 = vector.broadcast %37 : vector<1x256xf32> to vector<8x256xf32>
    %40 = arith.mulf %38, %39 : vector<8x256xf32>
    %41 = arith.addf %35, %40 : vector<8x256xf32>
    %42 = vector.extract_strided_slice %32 {offsets = [0, 1], sizes = [8, 1], strides = [1, 1]} : vector<8x4xf32> to vector<8x1xf32>
    %43 = vector.extract_strided_slice %3 {offsets = [1, 0], sizes = [1, 256], strides = [1, 1]} : vector<4x256xf32> to vector<1x256xf32>
    %44 = vector.broadcast %42 : vector<8x1xf32> to vector<8x256xf32>
    %45 = vector.broadcast %43 : vector<1x256xf32> to vector<8x256xf32>
    %46 = arith.mulf %44, %45 : vector<8x256xf32>
    %47 = arith.addf %41, %46 : vector<8x256xf32>
    %48 = vector.extract_strided_slice %32 {offsets = [0, 2], sizes = [8, 1], strides = [1, 1]} : vector<8x4xf32> to vector<8x1xf32>
    %49 = vector.extract_strided_slice %3 {offsets = [2, 0], sizes = [1, 256], strides = [1, 1]} : vector<4x256xf32> to vector<1x256xf32>
    %50 = vector.broadcast %48 : vector<8x1xf32> to vector<8x256xf32>
    %51 = vector.broadcast %49 : vector<1x256xf32> to vector<8x256xf32>
    %52 = arith.mulf %50, %51 : vector<8x256xf32>
    %53 = arith.addf %47, %52 : vector<8x256xf32>
    %54 = vector.extract_strided_slice %32 {offsets = [0, 3], sizes = [8, 1], strides = [1, 1]} : vector<8x4xf32> to vector<8x1xf32>
    %55 = vector.extract_strided_slice %3 {offsets = [3, 0], sizes = [1, 256], strides = [1, 1]} : vector<4x256xf32> to vector<1x256xf32>
    %56 = vector.broadcast %54 : vector<8x1xf32> to vector<8x256xf32>
    %57 = vector.broadcast %55 : vector<1x256xf32> to vector<8x256xf32>
    %58 = arith.mulf %56, %57 : vector<8x256xf32>
    %59 = arith.addf %53, %58 : vector<8x256xf32>
    %60 = arith.addf %31, %59 : vector<8x256xf32>
    %cst = arith.constant 0.000000e+00 : f32
    %61 = vector.broadcast %cst : f32 to vector<8x256xf32>
    %62 = arith.maximumf %60, %61 : vector<8x256xf32>
    %c0_13 = arith.constant 0 : index
    %c0_14 = arith.constant 0 : index
    %63 = vector.load %arg8[%c0_13, %c0_14] : memref<1x8xf32, #tpu.memory_space<vmem>>, vector<1x8xf32>
    %c0_15 = arith.constant 0 : index
    %c0_16 = arith.constant 0 : index
    %64 = vector.load %arg9[%c0_15, %c0_16] : memref<1x1xf32, #tpu.memory_space<vmem>>, vector<1x1xf32>
    %65 = vector.shape_cast %64 : vector<1x1xf32> to vector<1x1xf32>
    %66 = vector.broadcast %65 : vector<1x1xf32> to vector<1x256xf32>
    %67 = vector.extract_strided_slice %63 {offsets = [0, 0], sizes = [1, 1], strides = [1, 1]} : vector<1x8xf32> to vector<1x1xf32>
    %68 = vector.extract_strided_slice %62 {offsets = [0, 0], sizes = [1, 256], strides = [1, 1]} : vector<8x256xf32> to vector<1x256xf32>
    %69 = vector.broadcast %67 : vector<1x1xf32> to vector<1x256xf32>
    %70 = arith.mulf %69, %68 : vector<1x256xf32>
    %71 = arith.addf %66, %70 : vector<1x256xf32>
    %72 = vector.extract_strided_slice %63 {offsets = [0, 1], sizes = [1, 1], strides = [1, 1]} : vector<1x8xf32> to vector<1x1xf32>
    %73 = vector.extract_strided_slice %62 {offsets = [1, 0], sizes = [1, 256], strides = [1, 1]} : vector<8x256xf32> to vector<1x256xf32>
    %74 = vector.broadcast %72 : vector<1x1xf32> to vector<1x256xf32>
    %75 = arith.mulf %74, %73 : vector<1x256xf32>
    %76 = arith.addf %71, %75 : vector<1x256xf32>
    %77 = vector.extract_strided_slice %63 {offsets = [0, 2], sizes = [1, 1], strides = [1, 1]} : vector<1x8xf32> to vector<1x1xf32>
    %78 = vector.extract_strided_slice %62 {offsets = [2, 0], sizes = [1, 256], strides = [1, 1]} : vector<8x256xf32> to vector<1x256xf32>
    %79 = vector.broadcast %77 : vector<1x1xf32> to vector<1x256xf32>
    %80 = arith.mulf %79, %78 : vector<1x256xf32>
    %81 = arith.addf %76, %80 : vector<1x256xf32>
    %82 = vector.extract_strided_slice %63 {offsets = [0, 3], sizes = [1, 1], strides = [1, 1]} : vector<1x8xf32> to vector<1x1xf32>
    %83 = vector.extract_strided_slice %62 {offsets = [3, 0], sizes = [1, 256], strides = [1, 1]} : vector<8x256xf32> to vector<1x256xf32>
    %84 = vector.broadcast %82 : vector<1x1xf32> to vector<1x256xf32>
    %85 = arith.mulf %84, %83 : vector<1x256xf32>
    %86 = arith.addf %81, %85 : vector<1x256xf32>
    %87 = vector.extract_strided_slice %63 {offsets = [0, 4], sizes = [1, 1], strides = [1, 1]} : vector<1x8xf32> to vector<1x1xf32>
    %88 = vector.extract_strided_slice %62 {offsets = [4, 0], sizes = [1, 256], strides = [1, 1]} : vector<8x256xf32> to vector<1x256xf32>
    %89 = vector.broadcast %87 : vector<1x1xf32> to vector<1x256xf32>
    %90 = arith.mulf %89, %88 : vector<1x256xf32>
    %91 = arith.addf %86, %90 : vector<1x256xf32>
    %92 = vector.extract_strided_slice %63 {offsets = [0, 5], sizes = [1, 1], strides = [1, 1]} : vector<1x8xf32> to vector<1x1xf32>
    %93 = vector.extract_strided_slice %62 {offsets = [5, 0], sizes = [1, 256], strides = [1, 1]} : vector<8x256xf32> to vector<1x256xf32>
    %94 = vector.broadcast %92 : vector<1x1xf32> to vector<1x256xf32>
    %95 = arith.mulf %94, %93 : vector<1x256xf32>
    %96 = arith.addf %91, %95 : vector<1x256xf32>
    %97 = vector.extract_strided_slice %63 {offsets = [0, 6], sizes = [1, 1], strides = [1, 1]} : vector<1x8xf32> to vector<1x1xf32>
    %98 = vector.extract_strided_slice %62 {offsets = [6, 0], sizes = [1, 256], strides = [1, 1]} : vector<8x256xf32> to vector<1x256xf32>
    %99 = vector.broadcast %97 : vector<1x1xf32> to vector<1x256xf32>
    %100 = arith.mulf %99, %98 : vector<1x256xf32>
    %101 = arith.addf %96, %100 : vector<1x256xf32>
    %102 = vector.extract_strided_slice %63 {offsets = [0, 7], sizes = [1, 1], strides = [1, 1]} : vector<1x8xf32> to vector<1x1xf32>
    %103 = vector.extract_strided_slice %62 {offsets = [7, 0], sizes = [1, 256], strides = [1, 1]} : vector<8x256xf32> to vector<1x256xf32>
    %104 = vector.broadcast %102 : vector<1x1xf32> to vector<1x256xf32>
    %105 = arith.mulf %104, %103 : vector<1x256xf32>
    %106 = arith.addf %101, %105 : vector<1x256xf32>
    %107 = arith.negf %106 : vector<1x256xf32>
    %108 = math.exp %107 : vector<1x256xf32>
    %cst_17 = arith.constant 1.000000e+00 : f32
    %109 = vector.broadcast %cst_17 : f32 to vector<1x256xf32>
    %110 = arith.addf %109, %108 : vector<1x256xf32>
    %111 = arith.divf %109, %110 : vector<1x256xf32>
    %112 = vector.broadcast %111 : vector<1x256xf32> to vector<4x256xf32>
    %113 = arith.mulf %3, %112 : vector<4x256xf32>
    %c0_18 = arith.constant 0 : index
    %c0_19 = arith.constant 0 : index
    %c0_20 = arith.constant 0 : index
    %114 = vector.load %arg10[%c0_18, %c0_19, %c0_20] : memref<1x4x256xf32, #tpu.memory_space<vmem>>, vector<1x4x256xf32>
    %115 = vector.shape_cast %114 : vector<1x4x256xf32> to vector<4x256xf32>
    %116 = vector.shape_cast %113 : vector<4x256xf32> to vector<1x4x256xf32>
    tpu.vector_store %arg10[%c0_18, %c0_19, %c0_20], %116 {strides = array<i32>} : memref<1x4x256xf32, #tpu.memory_space<vmem>>, vector<1x4x256xf32>,
    return
  }
  func.func @transform_0(%arg0: i32, %arg1: i32) -> (i32, i32, i32) {
    %c0_i32 = arith.constant 0 : i32
    %c0_i32_0 = arith.constant 0 : i32
    return %arg0, %c0_i32, %arg1 : i32, i32, i32
  }
  func.func @transform_1(%arg0: i32, %arg1: i32) -> (i32, i32, i32) {
    %c0_i32 = arith.constant 0 : i32
    %c0_i32_0 = arith.constant 0 : i32
    return %arg0, %c0_i32, %arg1 : i32, i32, i32
  }
  func.func @transform_2(%arg0: i32, %arg1: i32) -> (i32, i32) {
    %c0_i32 = arith.constant 0 : i32
    %c0_i32_0 = arith.constant 0 : i32
    %c0_i32_1 = arith.constant 0 : i32
    return %c0_i32, %c0_i32_0 : i32, i32
  }
  func.func @transform_3(%arg0: i32, %arg1: i32) -> (i32, i32) {
    %c0_i32 = arith.constant 0 : i32
    %c0_i32_0 = arith.constant 0 : i32
    %c0_i32_1 = arith.constant 0 : i32
    return %c0_i32, %c0_i32_0 : i32, i32
  }
  func.func @transform_4(%arg0: i32, %arg1: i32) -> (i32, i32) {
    %c0_i32 = arith.constant 0 : i32
    %c0_i32_0 = arith.constant 0 : i32
    %c0_i32_1 = arith.constant 0 : i32
    return %c0_i32, %c0_i32_0 : i32, i32
  }
  func.func @transform_5(%arg0: i32, %arg1: i32) -> (i32, i32) {
    %c0_i32 = arith.constant 0 : i32
    %c0_i32_0 = arith.constant 0 : i32
    %c0_i32_1 = arith.constant 0 : i32
    return %c0_i32, %c0_i32_0 : i32, i32
  }
  func.func @transform_6(%arg0: i32, %arg1: i32) -> (i32, i32) {
    %c0_i32 = arith.constant 0 : i32
    %c0_i32_0 = arith.constant 0 : i32
    %c0_i32_1 = arith.constant 0 : i32
    return %c0_i32, %c0_i32_0 : i32, i32
  }
  func.func @transform_7(%arg0: i32, %arg1: i32) -> (i32, i32) {
    %c0_i32 = arith.constant 0 : i32
    %c0_i32_0 = arith.constant 0 : i32
    %c0_i32_1 = arith.constant 0 : i32
    return %c0_i32, %c0_i32_0 : i32, i32
  }
  func.func @transform_8(%arg0: i32, %arg1: i32) -> (i32, i32, i32) {
    %c0_i32 = arith.constant 0 : i32
    %c0_i32_0 = arith.constant 0 : i32
    return %arg0, %c0_i32, %arg1 : i32, i32, i32
  }
}

</mosaic_0001>

<bundles_post_ra>
// kernel: tpu_custom_call.1
= control target key start
LH: loop header
LB: loop body
LE: loop exit
PB: predicated region body
PF: predicated region fallthrough
CT: control target
= control target key end

     0   :  { %s1296_s0 = inlined_call_operand.vmem [shape: f32[2,4,256], index: 0, kind: input, shape index: {}]   ;;  %s1297_s1 = inlined_call_operand.vmem [shape: f32[2,4,256], index: 1, kind: input, shape index: {}]   ;;  %s1298_s2 = inlined_call_operand.vmem [shape: f32[8,4], index: 2, kind: input, shape index: {}]   ;;  %s1299_s3 = inlined_call_operand.vmem [shape: f32[8,1], index: 3, kind: input, shape index: {}]   ;;  %s1300_s4 = inlined_call_operand.vmem [shape: f32[8,4], index: 4, kind: input, shape index: {}]   ;;  %s1301_s5 = inlined_call_operand.vmem [shape: f32[8,1], index: 5, kind: input, shape index: {}]   ;;  %s1302_s6 = inlined_call_operand.vmem [shape: f32[1,8], index: 6, kind: input, shape index: {}]   ;;  %s1303_s7 = inlined_call_operand.<no memory space> [shape: f32[1,1], index: 7, kind: input, shape index: {}]   ;;  %s1304_s8 = inlined_call_operand.hbm [shape: f32[2,4,256], index: 8, kind: output, shape index: {}]  }
   0x1   :  { %v13_v0 = vstv %s1303_s7 }
   0x2   :  { %14 = vst [vmem:[#allocation2] sm:$0x1] %v13_v0 }
   0x3   :  { %15 = vsyncpa [#allocation4], 0 }
   0x4   :  { %17 = vsyncpa [#allocation4 + $0x1], 0  ;;  %s1136_s29 = smov 0   ;;  %s1138_s30 = smov 0  }
   0x5   :  { %s1140_s9 = smov 0   ;;  %s1142_s10 = smov 0  }
   0x6   :  { %s1144_s11 = smov 0   ;;  %s1146_s12 = smov 0  }
   0x7 LB: > { %s892_s7 = sadd.s32 4294967295, %s1077_s12   ;;  %s893_s13 = sadd.s32 4294967294, %s1077_s12   ;;  %s1077_s12 = sphi %s1146_s12, %s23_s12   ;;  %s1073_s11 = sphi %s1144_s11, %s1311_s11   ;;  %s1069_s10 = sphi %s1142_s10, %s1310_s10   ;;  %s1065_s9 = sphi %s1140_s9, %s1309_s9   ;;  %s1061_s30 = sphi %s1138_s30, %s1308_s30   ;;  %s1057_s29 = sphi %s1136_s29, %s1307_s29  }
   0x8   : > { %s35_s14 = sadd.s32 1, %s1073_s11  ;;  %s226_s15 = sadd.s32 1, %s1065_s9 }
   0x9   : > { %p37_p0 = scmp.ge.s32.totalorder %s35_s14, 2  ;;  %p236_p1 = scmp.ne.s32.totalorder %s1065_s9, %s1061_s30 }
   0xa   : > { %p237_p2 = scmp.eq.s32.totalorder %s892_s7, 1  ;;  %p242_p3 = scmp.ne.s32.totalorder %s1061_s30, %s1057_s29 }
   0xb   : > { %s1313_s14 = smov (%p37_p0, %s35_s14), 0  ;;  %p243_p5 = scmp.eq.s32.totalorder %s893_s13, 1 }
   0xc   : > { %p1176_p4 = por %p237_p2, %p236_p1  ;;  %s221_s17 = ssub.s32 %s1073_s11, %s1313_s14 }
   0xd   : > { %p896_p6 = scmp.ge.s32.totalorder %s1077_s12, 1  ;;  %p224_p7 = scmp.eq.s32.totalorder %s221_s17, 0 }
   0xe   : > { %p1183_p8 = por %p243_p5, %p242_p3  ;;  %p305_p9 = scmp.lt.s32.totalorder %s1077_s12, 3 }
   0xf   : > { %s1189_s19 = scalar_select %p224_p7, %s1065_s9, %s226_s15  }
  0x10   : > { %p306_p10 = pnand %p896_p6, %p305_p9 }
  0x11   : > { %v376_v1 = vld [vmem:[%s1299_s3] sm:$0xff] (!%p306_p10)  ;;  %v1079_v3 = vmov (!%p306_p10), 0   ;;  %v1080_v5 = vmov (!%p306_p10), 1   ;;  %v1081_v7 = vmov (!%p306_p10), 2   ;;  %v1082_v8 = vmov (!%p306_p10), 3   ;;  %p353_p11 = scmp.lt.s32.totalorder (!%p306_p10), %s1069_s10, 1 }
  0x12   : > { %309 = sbr.rel (%p306_p10) target bundleno = 253 (0xfd), region = 52  ;;  %v375_v2 = vld [vmem:[%s1298_s2] sm:$0xff] (!%p306_p10)  ;;  %976 = vset.pattern.permute.xlu1 (!%p306_p10), %v1079_v3  ;;  %975 = vset.pattern.permute.xlu0 (!%p306_p10), %v1079_v3  ;;  %v1083_v11 = vmov (!%p306_p10), 4   ;;  %v1084_v12 = vmov (!%p306_p10), 7   ;;  %v1085_v13 = vmov (!%p306_p10), 5   ;;  %v1086_v14 = vmov (!%p306_p10), 6  }
  0x13   : > { %379 = vperm.xlu1 (!%p306_p10), %976, %v376_v1   ;;  %384 = vperm.xlu0 (!%p306_p10), %975, %v375_v2   ;;  %v488_v4 = vld [vmem:[%s1300_s4] sm:$0xff] (!%p306_p10)  ;;  %v388_v15 = vlaneseq (!%p306_p10)  ;;  %s349_s25 = sand.u32 (!%p306_p10), 1, %s1061_s30   ;;  %s911_s27 = sshll.u32 (!%p306_p10), %s1069_s10, 7 }
  0x14   : > { %v489_v6 = vld [vmem:[%s1301_s5] sm:$0xff] (!%p306_p10)  ;;  %s897_s26 = sshll.u32 (!%p306_p10), %s349_s25, 3  ;;  %s1249_s17 = scalar_lea.hbm (!%p306_p10), %s1304_s8, %s911_s27 }
  0x15   : > { %v606_v9 = vld [vmem:[#allocation2] sm:$0x1] (!%p306_p10)  ;;  %v389_v16 = vshrl.u32 (!%p306_p10), %v388_v15, 7  ;;  %s351_s28 = scalar_lea.vmem (!%p306_p10), [#allocation3], %s897_s26  ;;  %s782_s20 = scalar_lea.sflag (!%p306_p10), [#allocation4], %s349_s25 }
  0x16   : > { %v605_v10 = vld [vmem:[%s1302_s6] sm:$0x1] (!%p306_p10)  ;;  %s798_s7 = sshll.u32 (!%p306_p10), %s351_s28, 4  ;;  %s1251_s7 = int_to_ptr.vmem [resolvable:$true] %s798_s7 }
  0x17   : > { %977 = vset.pattern.permute.xlu1 (!%p306_p10), %v1080_v5  ;;  %497 = vperm.xlu0 (!%p306_p10), %975, %v488_v4   ;;  %v1216_v20 = vsub.s32 (!%p306_p10), 0, %v389_v16  ;;  %v394_v21 = vsub.s32 (!%p306_p10), 4, %v389_v16  ;;  %v416_v23 = vsub.s32 (!%p306_p10), 1, %v389_v16  ;;  %v420_v24 = vsub.s32 (!%p306_p10), 5, %v389_v16 }
  0x18   : > { %411 = vperm.xlu1 (!%p306_p10), %977, %v375_v2   ;;  %v442_v31 = vsub.s32 (!%p306_p10), 2, %v389_v16  ;;  %v446_v32 = vsub.s32 (!%p306_p10), 6, %v389_v16  ;;  %v468_v33 = vsub.s32 (!%p306_p10), 3, %v389_v16  ;;  %v472_v34 = vsub.s32 (!%p306_p10), 7, %v389_v16 }
  0x19   : > { %s354_s13 = scalar_select %p353_p11, %s1069_s10, 1 }
  0x1a   : > { %s1087_s10 = smov [#allocation3]  }
  0x1b   : > { %492 = vperm.xlu0 %975, %v489_v6   ;;  %s909_s15 = sshll.u32 %s354_s13, 3  ;;  %s1003_s22 = sshll.u32 %s1087_s10, 4  ;;  %s1004_s22 = int_to_ptr.vmem [resolvable:$false] %s1003_s22 }
  0x1c   : > { %524 = vperm.xlu1 %977, %v488_v4   ;;  %s370_s21 = scalar_lea.vmem %s1297_s1, %s909_s15  ;;  %s360_s24 = scalar_lea.vmem %s1296_s0, %s909_s15 }
  0x1d   : > { %v1214_v19 = vld [vmem:[%s370_s21] sm:$0xff]  ;;  %s999_s21 = scalar_lea.vmem %s1251_s7, 128  ;;  %s1005_s23 = scalar_lea.vmem %s1004_s22, 256 }
  0x1e   : > { %v373_v22 = vld [vmem:[%s360_s24] sm:$0xff]  ;;  %v504_v25 = vrot.slane %v1214_v19, %v1216_v20  ;;  %v508_v27 = vrot.slane %v1214_v19, %v394_v21  ;;  %v530_v38 = vrot.slane %v1214_v19, %v416_v23  ;;  %v534_v40 = vrot.slane %v1214_v19, %v420_v24  ;;  %p1000_p12 = scmp.ne.s32.totalorder %s1251_s7, %s999_s21  ;;  %p1006_p1 = scmp.lt.s32.totalorder %s1251_s7, %s1004_s22 }
  0x1f   : > { %978 = vset.pattern.permute.xlu0 %v1081_v7  ;;  %v391_v28 = vrot.slane %v373_v22, %v1216_v20  ;;  %v395_v29 = vrot.slane %v373_v22, %v394_v21  ;;  %v417_v35 = vrot.slane %v373_v22, %v416_v23  ;;  %v421_v36 = vrot.slane %v373_v22, %v420_v24  ;;  %p1007_p2 = scmp.lt.s32.totalorder %s1005_s23, %s999_s21 }
  0x20   : > { %979 = vset.pattern.permute.xlu1 %v1081_v7  ;;  %437 = vperm.xlu0 %978, %v375_v2   ;;  %v514_v37 = vrot.slane %v504_v25, %v1216_v20  ;;  %v518_v39 = vrot.slane %v508_v27, %v1216_v20  ;;  %v443_v45 = vrot.slane %v373_v22, %v442_v31  ;;  %p1001_p13 = pnand %p1000_p12, %p1176_p4 }
  0x21   : > { %550 = vperm.xlu1 %979, %v488_v4   ;;  %v401_v42 = vrot.slane %v391_v28, %v1216_v20  ;;  %v405_v43 = vrot.slane %v395_v29, %v1216_v20  ;;  %v556_v46 = vrot.slane %v1214_v19, %v442_v31  ;;  %v447_v47 = vrot.slane %v373_v22, %v446_v32  ;;  %p1008_p3 = por %p1007_p2, %p1006_p1 }
  0x22   : > { %v560_v48 = vrot.slane %v1214_v19, %v446_v32  ;;  %v582_v49 = vrot.slane %v1214_v19, %v468_v33  ;;  %v586_v50 = vrot.slane %v1214_v19, %v472_v34  ;;  %v427_v51 = vrot.slane %v417_v35, %v416_v23  ;;  %p1002_p0 = pneg %p1001_p13 }
  0x23   : > { %v431_v52 = vrot.slane %v421_v36, %v416_v23  ;;  %v540_v54 = vrot.slane %v530_v38, %v416_v23  ;;  %v544_v56 = vrot.slane %v534_v40, %v416_v23  ;;  %v469_v57 = vrot.slane %v373_v22, %v468_v33 }
  0x24   : > { %981 = vset.pattern.permute.xlu0 %v1082_v8  ;;  %v473_v58 = vrot.slane %v373_v22, %v472_v34  ;;  %v453_v62 = vrot.slane %v443_v45, %v442_v31  ;;  %v566_v63 = vrot.slane %v556_v46, %v442_v31  ;;  %v457_v0 = vrot.slane %v447_v47, %v442_v31  ;;  %p1009_p5 = pnand %p1008_p3, %p1002_p0 }
  0x25   : > { %980 = vset.pattern.permute.xlu1 %v1082_v8  ;;  %576 = vperm.xlu0 %981, %v488_v4   ;;  %v596_v4 = vrot.slane %v586_v50, %v468_v33 }
  0x26   : > { %463 = vperm.xlu1 %980, %v375_v2   ;;  %v570_v2 = vrot.slane %v560_v48, %v442_v31 }
  0x29   : > { %984 = vset.pattern.permute.xlu0 %v1079_v3 }
  0x2a   : > { %982 = vset.pattern.permute.xlu1 %v1079_v3  ;;  %609 = vperm.xlu0 %984, %v606_v9   ;;  %v592_v3 = vrot.slane %v582_v49, %v468_v33 }
  0x2b   : > { %618 = vperm.xlu1 %982, %v605_v10  }
  0x2e   : > { %987 = vset.pattern.permute.xlu0 %v1083_v11  ;;  %v479_v11 = vrot.slane %v469_v57, %v468_v33 }
  0x2f   : > { %983 = vset.pattern.permute.xlu1 %v1080_v5  ;;  %684 = vperm.xlu0 %987, %v605_v10  }
  0x30   : > { %630 = vperm.xlu1 %983, %v605_v10  }
  0x33   : > { %990 = vset.pattern.permute.xlu0 %v1084_v12  ;;  %v483_v12 = vrot.slane %v473_v58, %v468_v33 }
  0x34   : > { %985 = vset.pattern.permute.xlu1 %v1081_v7  ;;  %738 = vperm.xlu0 %990, %v605_v10  }
  0x35   : > { %648 = vperm.xlu1 %985, %v605_v10  }
  0x39   : > { %986 = vset.pattern.permute.xlu1 %v1082_v8 }
  0x3a   : > { %666 = vperm.xlu1 %986, %v605_v10  }
  0x3e   : > { %988 = vset.pattern.permute.xlu1 %v1085_v13 }
  0x3f   : > { %702 = vperm.xlu1 %988, %v605_v10  }
  0x43   : > { %989 = vset.pattern.permute.xlu1 %v1086_v14 }
  0x44   : > { %720 = vperm.xlu1 %989, %v605_v10  }
  0x92   : > { %v380_v17 = vpop.permute.xlu1 %379  ;;  %v385_v18 = vpop.permute.xlu0 %384 }
  0x93   : > { %v406_v59 = vmul.f32 %v401_v42, %v385_v18  ;;  %v407_v60 = vmul.f32 %v405_v43, %v385_v18 }
  0x95   : > { %v408_v13 = vadd.f32 %v406_v59, %v380_v17  ;;  %v409_v14 = vadd.f32 %v407_v60, %v380_v17 }
  0x96   : > { %v498_v26 = vpop.permute.xlu0 %497 }
  0x97   : > { %v412_v30 = vpop.permute.xlu1 %411  ;;  %v519_v53 = vmul.f32 %v514_v37, %v498_v26  ;;  %v520_v55 = vmul.f32 %v518_v39, %v498_v26 }
  0x98   : > { %v432_v5 = vmul.f32 %v427_v51, %v412_v30  ;;  %v433_v6 = vmul.f32 %v431_v52, %v412_v30 }
  0x9a   : > { %v493_v41 = vpop.permute.xlu0 %492  ;;  %v434_v23 = vadd.f32 %v432_v5, %v408_v13  ;;  %v435_v24 = vadd.f32 %v433_v6, %v409_v14 }
  0x9b   : > { %v525_v44 = vpop.permute.xlu1 %524  ;;  %v521_v8 = vadd.f32 %v519_v53, %v493_v41  ;;  %v522_v10 = vadd.f32 %v520_v55, %v493_v41 }
  0x9c   : > { %v545_v7 = vmul.f32 %v540_v54, %v525_v44  ;;  %v546_v9 = vmul.f32 %v544_v56, %v525_v44 }
  0x9e   : > { %v547_v25 = vadd.f32 %v545_v7, %v521_v8  ;;  %v548_v28 = vadd.f32 %v546_v9, %v522_v10 }
  0x9f   : > { %v438_v61 = vpop.permute.xlu0 %437 }
  0xa0   : > { %v551_v1 = vpop.permute.xlu1 %550  ;;  %v458_v15 = vmul.f32 %v453_v62, %v438_v61  ;;  %v459_v18 = vmul.f32 %v457_v0, %v438_v61 }
  0xa1   : > { %v571_v16 = vmul.f32 %v566_v63, %v551_v1  ;;  %v572_v21 = vmul.f32 %v570_v2, %v551_v1 }
  0xa2   : > { %v460_v32 = vadd.f32 %v458_v15, %v434_v23  ;;  %v461_v35 = vadd.f32 %v459_v18, %v435_v24 }
  0xa3   : > { %v573_v34 = vadd.f32 %v571_v16, %v547_v25  ;;  %v574_v33 = vadd.f32 %v572_v21, %v548_v28 }
  0xa4   : > { %v577_v22 = vpop.permute.xlu0 %576 }
  0xa5   : > { %v597_v26 = vmul.f32 %v592_v3, %v577_v22  ;;  %v464_v27 = vpop.permute.xlu1 %463  ;;  %v598_v29 = vmul.f32 %v596_v4, %v577_v22 }
  0xa6   : > { %v484_v30 = vmul.f32 %v479_v11, %v464_v27  ;;  %v485_v31 = vmul.f32 %v483_v12, %v464_v27 }
  0xa7   : > { %v599_v36 = vadd.f32 %v597_v26, %v573_v34  ;;  %v600_v37 = vadd.f32 %v598_v29, %v574_v33 }
  0xa8   : > { %v486_v17 = vadd.f32 %v484_v30, %v460_v32  ;;  %v487_v38 = vadd.f32 %v485_v31, %v461_v35 }
  0xa9   : > { %v610_v43 = vpop.permute.xlu0 %609 }
  0xaa   : > { %v619_v39 = vpop.permute.xlu1 %618  ;;  %v601_v40 = vadd.f32 %v599_v36, %v486_v17  ;;  %v602_v41 = vadd.f32 %v600_v37, %v487_v38  ;;  %v615_v52 = vrot.slane %v610_v43, %v1216_v20 }
  0xab   : > { %v624_v46 = vrot.slane %v619_v39, %v1216_v20 }
  0xac   : > { %v603_v45 = vmax.f32 %v601_v40, 0.0  ;;  %v604_v47 = vmax.f32 %v602_v41, 0.0 }
  0xae   : > { %v625_v51 = vmul.f32 %v624_v46, %v603_v45  ;;  %v626_v54 = vmul.f32 %v624_v46, %v604_v47  ;;  %v685_v55 = vpop.permute.xlu0 %684 }
  0xaf   : > { %v631_v42 = vpop.permute.xlu1 %630  ;;  %v690_v61 = vrot.slane %v685_v55, %v1216_v20 }
  0xb0   : > { %v636_v44 = vrot.slane %v631_v42, %v1216_v20  ;;  %v627_v60 = vadd.f32 %v625_v51, %v615_v52  ;;  %v628_v63 = vadd.f32 %v626_v54, %v615_v52 }
  0xb1   : > { %v691_v7 = vmul.f32 %v690_v61, %v603_v45  ;;  %v692_v8 = vmul.f32 %v690_v61, %v604_v47 }
  0xb2   : > { %v637_v48 = vmul.f32 %v636_v44, %v603_v45  ;;  %v638_v49 = vmul.f32 %v636_v44, %v604_v47 }
  0xb3   : > { %v739_v14 = vpop.permute.xlu0 %738  ;;  %v695_v21 = vrot.slane %v691_v7, 4  ;;  %v696_v24 = vrot.slane %v692_v8, 4 }
  0xb4   : > { %v649_v50 = vpop.permute.xlu1 %648  ;;  %v641_v58 = vrot.slane %v637_v48, 1  ;;  %v642_v59 = vrot.slane %v638_v49, 1  ;;  %v744_v25 = vrot.slane %v739_v14, %v1216_v20 }
  0xb5   : > { %v654_v53 = vrot.slane %v649_v50, %v1216_v20 }
  0xb6   : > { %v645_v3 = vadd.f32 %v641_v58, %v627_v60  ;;  %v646_v4 = vadd.f32 %v642_v59, %v628_v63  ;;  %v745_v32 = vmul.f32 %v744_v25, %v603_v45  ;;  %v746_v34 = vmul.f32 %v744_v25, %v604_v47 }
  0xb7   : > { %v655_v56 = vmul.f32 %v654_v53, %v603_v45  ;;  %v656_v57 = vmul.f32 %v654_v53, %v604_v47 }
  0xb8   : > { %v749_v39 = vrot.slane %v745_v32, 7  ;;  %v750_v40 = vrot.slane %v746_v34, 7 }
  0xb9   : > { %v667_v62 = vpop.permute.xlu1 %666  ;;  %v659_v0 = vrot.slane %v655_v56, 2  ;;  %v660_v1 = vrot.slane %v656_v57, 2 }
  0xba   : > { %v672_v2 = vrot.slane %v667_v62, %v1216_v20 }
  0xbb   : > { %v663_v9 = vadd.f32 %v659_v0, %v645_v3  ;;  %v664_v10 = vadd.f32 %v660_v1, %v646_v4 }
  0xbc   : > { %v673_v5 = vmul.f32 %v672_v2, %v603_v45  ;;  %v674_v6 = vmul.f32 %v672_v2, %v604_v47 }
  0xbe   : > { %v677_v11 = vrot.slane %v673_v5, 3  ;;  %v678_v12 = vrot.slane %v674_v6, 3  ;;  %v703_v13 = vpop.permute.xlu1 %702 }
  0xbf   : > { %v708_v15 = vrot.slane %v703_v13, %v1216_v20 }
  0xc0   : > { %v681_v16 = vadd.f32 %v677_v11, %v663_v9  ;;  %v682_v18 = vadd.f32 %v678_v12, %v664_v10 }
  0xc1   : > { %v709_v22 = vmul.f32 %v708_v15, %v603_v45  ;;  %v710_v23 = vmul.f32 %v708_v15, %v604_v47 }
  0xc2   : > { %v699_v26 = vadd.f32 %v695_v21, %v681_v16  ;;  %v700_v28 = vadd.f32 %v696_v24, %v682_v18 }
  0xc3   : > { %v721_v27 = vpop.permute.xlu1 %720  ;;  %v713_v29 = vrot.slane %v709_v22, 5  ;;  %v714_v30 = vrot.slane %v710_v23, 5 }
  0xc4   : > { %v726_v31 = vrot.slane %v721_v27, %v1216_v20 }
  0xc5   : > { %v717_v36 = vadd.f32 %v713_v29, %v699_v26  ;;  %v718_v17 = vadd.f32 %v714_v30, %v700_v28 }
  0xc6   : > { %v727_v35 = vmul.f32 %v726_v31, %v603_v45  ;;  %v728_v33 = vmul.f32 %v726_v31, %v604_v47 }
  0xc8   : > { %v731_v37 = vrot.slane %v727_v35, 6  ;;  %v732_v38 = vrot.slane %v728_v33, 6 }
  0xca   : > { %v735_v41 = vadd.f32 %v731_v37, %v717_v36  ;;  %v736_v42 = vadd.f32 %v732_v38, %v718_v17 }
  0xcc   : > { %v753_v43 = vadd.f32 %v749_v39, %v735_v41  ;;  %v754_v44 = vadd.f32 %v750_v40, %v736_v42 }
  0xce   : > { %v902_v46 = vmul.f32 -1.442695, %v753_v43  ;;  %v903_v48 = vmul.f32 -1.442695, %v754_v44 }
  0xd0   : > { %991 = vpow2.f32 %v902_v46 }
  0xd1   : > { %993 = vpow2.f32 %v903_v48 }
  0xda   : > { %v992_v49 = vpop.eup %991 }
  0xdb   : > { %v994_v50 = vpop.eup %993  ;;  %v761_v45 = vadd.f32 1.0, %v992_v49 }
  0xdc   : > { %v762_v47 = vadd.f32 1.0, %v994_v50 }
  0xdd   : > { %995 = vrcp.f32 %v761_v45 }
  0xde   : > { %997 = vrcp.f32 %v762_v47 }
  0xe7   : > { %v996_v51 = vpop.eup %995 }
  0xe8   : > { %v998_v52 = vpop.eup %997  ;;  %v770_v53 = vrot.slane %v996_v51, %v1216_v20 }
  0xe9   : > { %v774_v54 = vrot.slane %v998_v52, %v1216_v20 }
  0xeb   : > { %v777_v55 = vcombine.low %v770_v53, %v774_v54 }
  0xed   : > { %v779_v56 = vmul.f32 %v777_v55, %v1214_v19 }
  0xef   : > { %780 = vst [vmem:[%s351_s28] sm:$0xff] %v779_v56 }
  0xf0   : > { %1012 = shalt.err (!%p1009_p5)
}
  0xf1   : > { %s1013_s24 = scalar_lea.hbm %s1249_s17, 128  ;;  %s1017_s27 = scalar_lea.hbm %s1304_s8, 256 }
  0xf2   : > { %p1014_p6 = scmp.ne.s32.totalorder %s1249_s17, %s1013_s24  ;;  %p1018_p10 = scmp.lt.u32.totalorder %s1249_s17, %s1304_s8 }
  0xf3   : > { %p1019_p11 = scmp.lt.u32.totalorder %s1017_s27, %s1013_s24  ;;  %p1021_p13 = scmp.lt.u32.totalorder %s1013_s24, %s1249_s17 }
  0xf4   : > { %p1015_p7 = pnand %p1014_p6, %p1176_p4 }
  0xf5   : > { %p1020_p12 = por %p1019_p11, %p1018_p10 }
  0xf6   : > { %p1016_p9 = pneg %p1015_p7 }
  0xf7   : > { %p1022_p0 = por %p1021_p13, %p1020_p12 }
  0xf9   : > { %p1023_p1 = pnand %p1022_p0, %p1016_p9 }
  0xfb   : > { %1026 = shalt.err (!%p1023_p1)
}
  0xfc   : > { %912 = dma.vmem_to_hbm [thread:$0]  (%p1176_p4), %s1251_s7, 128, %s1249_s17, %s782_s20  }
  0xfd PF: > { %p918_p2 = scmp.ge.s32.totalorder %s1077_s12, 2  ;;  %s810_s15 = sand.u32 1, %s1057_s29  }
  0xfe   : > { %s811_s21 = scalar_lea.sflag [#allocation4], %s810_s15 }
  0xff   : > { %p915_p3 = pnand %p918_p2, %p1183_p8 }
 0x101   : > { %1052 = dma.done.wait (!%p915_p3), %s811_s21, 128  }
 0x102   : > { %1054 = vsyncadd (!%p915_p3), %s811_s21, 4294967168  ;;  %s23_s12 = sadd.s32 1, %s1077_s12   ;;  %s1307_s29 = smov %s1061_s30 }
 0x103   : > { %p20_p5 = scmp.ge.s32.totalorder %s23_s12, 4   ;;  %s1308_s30 = smov %s1065_s9 }
 0x104   : > { %s1309_s9 = smov %s1189_s19  ;;  %s1310_s10 = smov %s1073_s11 }
 0x105   : > { %s1311_s11 = smov %s1313_s14  ;;  %22 = sbr.rel (!%p20_p5) target bundleno = 7 (0x7), region = 90 }
 0x10c   :  { %816 = vsyncpa [#allocation4], 1 }
 0x10d   :  { %818 = vsyncpa [#allocation4 + $0x1], 1 }

</bundles_post_ra>
